<compile_context>
chip_gen: v7x
topology: tpu7x:2x2x1
jax: 0.10.0
libtpu: 0.0.40
codegen_flags: <defaults>
</compile_context>

<pallas_src>
import jax
import jax.numpy as jnp
from jax.experimental import pallas as pl
from jax.experimental.pallas import tpu as pltpu

_LANES = 128


# ----------------------------------------------------------------------------
# Pallas kernel
# ----------------------------------------------------------------------------

def _pssilu_kernel(params_ref, x_ref, o_ref):
    """Elementwise PSSiLU on one (tile_rows, 128) slab.

    params_ref: SMEM (3,) f32 = [half_a, s1, s2] (scalar-prefetched), where
      y = x * (s1 * tanh(half_a * x) + s2)  ==  PSSiLU(x).
    """
    half_a = params_ref[0]
    s1 = params_ref[1]
    s2 = params_ref[2]

    x = x_ref[...].astype(jnp.float32)      # native-dtype load, f32 compute
    t = jnp.tanh(half_a * x)                # EUP transcendental
    o_ref[...] = (x * (s1 * t + s2)).astype(o_ref.dtype)


# ----------------------------------------------------------------------------
# Wrapper
# ----------------------------------------------------------------------------

def _sublanes_for(dtype) -> int:
    itemsize = jnp.dtype(dtype).itemsize
    return {4: 8, 2: 16, 1: 32}.get(itemsize, 8)


def pssilu(x, alpha, beta, *, tile_rows=4096):
    """PSSiLU forward. x: any shape/float dtype; alpha, beta: shape (1,) params."""
    orig_shape = x.shape
    dtype = x.dtype
    total = x.size

    sub = _sublanes_for(dtype)

    # Lane-dense 2D layout: (rows_aligned, 128), rows aligned to the sublane
    # packing unit. Padding only materializes when total isn't already a
    # multiple of 128*sub (at most sub*128-1 extra elements).
    rows = pl.cdiv(total, _LANES)
    rows_aligned = ((rows + sub - 1) // sub) * sub
    padded_total = rows_aligned * _LANES

    flat = x.reshape(-1)
    if padded_total != total:
        flat = jnp.pad(flat, (0, padded_total - total))
    x2 = flat.reshape(rows_aligned, _LANES)

    # Tile rows: cap by tile_rows, but try to keep >= ~8 grid steps so the
    # "parallel" axis can shard across megacore TCs (v7x).
    tr_target = ((pl.cdiv(rows_aligned, 8) + sub - 1) // sub) * sub
    tr = max(sub, min(tile_rows, tr_target, rows_aligned))
    grid_steps = pl.cdiv(rows_aligned, tr)

    # Host-side scalar algebra (done once, on the scalar path):
    #   sigmoid(a*x) - b = 0.5*tanh(0.5*a*x) + (0.5 - b)
    #   => y = x * (s1*tanh(half_a*x) + s2)
    a = jnp.abs(jnp.asarray(alpha, jnp.float32).reshape(()))
    b = jnp.abs(jnp.asarray(beta, jnp.float32).reshape(()))
    inv_denom = 1.0 / (1.0 - b)
    params = jnp.stack([0.5 * a, 0.5 * inv_denom, (0.5 - b) * inv_denom])

    itemsize = jnp.dtype(dtype).itemsize
    cost = pl.CostEstimate(
        flops=4 * total,
        transcendentals=total,
        bytes_accessed=2 * total * itemsize,
    )

    out = pl.pallas_call(
        _pssilu_kernel,
        out_shape=jax.ShapeDtypeStruct((rows_aligned, _LANES), dtype),
        grid_spec=pltpu.PrefetchScalarGridSpec(
            num_scalar_prefetch=1,                      # params -> SMEM
            grid=(grid_steps,),
            in_specs=[pl.BlockSpec((tr, _LANES), lambda i, p: (i, 0))],
            out_specs=pl.BlockSpec((tr, _LANES), lambda i, p: (i, 0)),
        ),
        compiler_params=pltpu.CompilerParams(
            dimension_semantics=("parallel",)),          # megacore sharding
        cost_estimate=cost,
    )(params, x2)

    if padded_total != total:
        return out.reshape(-1)[:total].reshape(orig_shape)
    return out.reshape(orig_shape)


pssilu_jit = jax.jit(pssilu)


# Pure-JAX reference (mirrors the PyTorch forward exactly).
def pssilu_ref(x, alpha, beta):
    a = jnp.abs(alpha)
    b = jnp.abs(beta)
    return x * (jax.nn.sigmoid(a * x) - b) / (1.0 - b)


# ----------------------------------------------------------------------------
# Demo
# ----------------------------------------------------------------------------

if __name__ == "__main__":
    key = jax.random.PRNGKey(0)
    x = jax.random.normal(key, (2, 4, 16, 16), jnp.float32)

    # nn.Parameter init values from the PyTorch module.
    alpha = jnp.array([1.0], jnp.float32)
    beta = jnp.array([1e-08], jnp.float32)

    y = pssilu_jit(x, alpha, beta)
    y = jax.block_until_ready(y)

    y_ref = pssilu_ref(x, alpha[0], beta[0])

    assert y.shape == x.shape, (y.shape, x.shape)
    assert y.dtype == x.dtype, (y.dtype, x.dtype)
    assert bool(jnp.all(jnp.isfinite(y)))
    max_err = float(jnp.max(jnp.abs(y - y_ref)))
    assert max_err < 1e-5, max_err

    print("KERNEL_OK")
</pallas_src>

<mosaic_0001>
module attributes {stable_mosaic.version = 11 : i64} {
  func.func @_pssilu_kernel(%arg0: i32, %arg1: memref<3xf32, #tpu.memory_space<smem>>, %arg2: memref<8x128xf32, #tpu.memory_space<vmem>>, %arg3: memref<8x128xf32, #tpu.memory_space<vmem>>) attributes {dimension_semantics = [#tpu.dimension_semantics<parallel>], iteration_bounds = array<i64: 2>, scalar_prefetch = 1 : i64, scratch_operands = 0 : i64, tpu.core_type = #tpu.core_type<tc>, window_params = [{transform_indices = @transform_0, window_bounds = array<i64: 8, 128>}, {transform_indices = @transform_1, window_bounds = array<i64: 8, 128>}]} {
    %c0 = arith.constant 0 : index
    %0 = memref.load %arg1[%c0] : memref<3xf32, #tpu.memory_space<smem>>
    %c1 = arith.constant 1 : index
    %1 = memref.load %arg1[%c1] : memref<3xf32, #tpu.memory_space<smem>>
    %c2 = arith.constant 2 : index
    %2 = memref.load %arg1[%c2] : memref<3xf32, #tpu.memory_space<smem>>
    %c0_0 = arith.constant 0 : index
    %c0_1 = arith.constant 0 : index
    %3 = vector.load %arg2[%c0_0, %c0_1] : memref<8x128xf32, #tpu.memory_space<vmem>>, vector<8x128xf32>
    %4 = vector.broadcast %0 : f32 to vector<8x128xf32>
    %5 = arith.mulf %4, %3 : vector<8x128xf32>
    %6 = math.tanh %5 : vector<8x128xf32>
    %7 = vector.broadcast %1 : f32 to vector<8x128xf32>
    %8 = arith.mulf %7, %6 : vector<8x128xf32>
    %9 = vector.broadcast %2 : f32 to vector<8x128xf32>
    %10 = arith.addf %8, %9 : vector<8x128xf32>
    %11 = arith.mulf %3, %10 : vector<8x128xf32>
    %c0_2 = arith.constant 0 : index
    %c0_3 = arith.constant 0 : index
    %12 = vector.load %arg3[%c0_2, %c0_3] : memref<8x128xf32, #tpu.memory_space<vmem>>, vector<8x128xf32>
    tpu.vector_store %arg3[%c0_2, %c0_3], %11 {strides = array<i32>} : memref<8x128xf32, #tpu.memory_space<vmem>>, vector<8x128xf32>,
    return
  }
  func.func @transform_0(%arg0: i32, %arg1: memref<3xf32, #tpu.memory_space<smem>>) -> (i32, i32) {
    %c0_i32 = arith.constant 0 : i32
    %c0_i32_0 = arith.constant 0 : i32
    return %arg0, %c0_i32 : i32, i32
  }
  func.func @transform_1(%arg0: i32, %arg1: memref<3xf32, #tpu.memory_space<smem>>) -> (i32, i32) {
    %c0_i32 = arith.constant 0 : i32
    %c0_i32_0 = arith.constant 0 : i32
    return %arg0, %c0_i32 : i32, i32
  }
}

</mosaic_0001>

<bundles_post_ra>
// kernel: pssilu.1
= control target key start
LH: loop header
LB: loop body
LE: loop exit
PB: predicated region body
PF: predicated region fallthrough
CT: control target
= control target key end

     0   :  { %s259_s0 = inlined_call_operand.vmem [shape: f32[3], index: 0, kind: input, shape index: {}]   ;;  %s260_s1 = inlined_call_operand.vmem [shape: f32[16,128], index: 1, kind: input, shape index: {}]   ;;  %s261_s2 = inlined_call_operand.vmem [shape: f32[16,128], index: 2, kind: output, shape index: {}]  }
   0x1   :  { %s7_s11 = sshll.u32 %s259_s0, 4  ;;  %s8_s11 = int_to_ptr.vmem [resolvable:$true] %s7_s11 }
   0x2   :  { %s207_s12 = scalar_lea.vmem %s8_s11, 16  ;;  %p212_p1 = scmp.lt.s32.totalorder %s8_s11, %s8_s11 }
   0x3   :  { %p208_p0 = scmp.ne.s32.totalorder %s8_s11, %s207_s12  ;;  %p213_p2 = scmp.lt.s32.totalorder %s207_s12, %s207_s12 }
   0x5   :  { %p214_p3 = por %p213_p2, %p212_p1 }
   0x7   :  { %p215_p4 = pnand %p214_p3, %p208_p0 }
   0x9   :  { %218 = shalt.err (!%p215_p4)  }
   0xa   :  { %s229_s13 = smov [#allocation3]  }
   0xb   :  { %10 = dma.vmem_to_smem %s8_s11, 16, %s229_s13, [#allocation2] }
   0xc   :  { %223 = dma.done.wait [#allocation2], 16 }
   0xd   :  { %224 = vsyncadd [#allocation2], 4294967280 }
   0xe   :  { %12 = sfence }
   0xf   :  { %s248_s14 = smov 0  }
  0x10 LB: > { %s185_s0 = sadd.s32 4294967295, %s227_s14   ;;  %p189_p5 = scmp.ge.s32.totalorder %s227_s14, 1  ;;  %s227_s14 = sphi %s248_s14, %s18_s14  }
  0x11   : > { %p93_p6 = scmp.lt.s32.totalorder %s227_s14, 3 }
  0x13   : > { %p94_p7 = pnand %p189_p5, %p93_p6 }
  0x14   : > { %p111_p8 = scmp.lt.s32.totalorder (!%p94_p7), %s185_s0, 1  ;;  %s119_s15 = sld [smem:[#allocation3]] (!%p94_p7) }
  0x15   : > { %97 = sbr.rel (%p94_p7) target bundleno = 52 (0x34), region = 24  ;;  %s192_s20 = sld [smem:[#allocation3 + $0x1]] (!%p94_p7) }
  0x16   : > { %s193_s21 = sld [smem:[#allocation3 + $0x2]] (!%p94_p7) }
  0x1a   : > { %v123_v1 = vstv (!%p94_p7), %s119_s15 }
  0x1b   : > { %v126_v3 = vstv (!%p94_p7), %s192_s20 }
  0x1c   : > { %s263_s0 = smov (!%p111_p8, %s185_s0), 1  ;;  %v128_v5 = vstv %s193_s21 }
  0x1d   : > { %s190_s16 = sshll.u32 %s263_s0, 3 }
  0x1e   : > { %s114_s19 = scalar_lea.vmem %s260_s1, %s190_s16  ;;  %s118_s24 = scalar_lea.vmem %s261_s2, %s190_s16 }
  0x1f   : > { %v122_v0 = vld [vmem:[%s114_s19] sm:$0xff] }
  0x20   : > { %v124_v2 = vmul.f32 %v123_v1, %v122_v0 }
  0x22   : > { %205 = vtanh.f32 %v124_v2 }
  0x2c   : > { %v206_v4 = vpop.eup %205 }
  0x2d   : > { %v127_v6 = vmul.f32 %v206_v4, %v126_v3 }
  0x2f   : > { %v129_v7 = vadd.f32 %v128_v5, %v127_v6 }
  0x31   : > { %v130_v8 = vmul.f32 %v129_v7, %v122_v0 }
  0x33   : > { %131 = vst [vmem:[%s118_s24] sm:$0xff] %v130_v8 }
  0x34 PF: > { %s18_s14 = sadd.s32 1, %s227_s14  }
  0x35   : > { %p15_p9 = scmp.ge.s32.totalorder %s18_s14, 4  }
  0x37   :  { %17 = sbr.rel (!%p15_p9) target bundleno = 16 (0x10), region = 54 }

</bundles_post_ra>
